<compile_context>
chip_gen: v5e
topology: v5e:2x2
jax: 0.10.0
libtpu: 0.0.40
codegen_flags: <defaults>
</compile_context>

<pallas_src>
import functools

import jax
import jax.numpy as jnp
from jax.experimental import pallas as pl
from jax.experimental.pallas import tpu as pltpu


def _round_up(a, m):
    return (a + m - 1) // m * m


def _vmem_capacity_bytes():
    """Physical VMEM per TensorCore; conservative fallback = v7x (64 MiB)."""
    try:
        return int(pltpu.get_tpu_info().vmem_capacity_bytes)
    except Exception:  # noqa: BLE001 - older/newer jax or non-TPU tracing
        return 64 * 1024 * 1024


def _num_tensorcores():
    """TensorCores per chip; defensive query, defaults to 1 (v5e/v6e)."""
    try:
        info = pltpu.get_tpu_info()
        for attr in ("num_cores", "num_tensorcores", "core_count",
                     "tensorcore_count", "num_cores_per_chip"):
            v = getattr(info, attr, None)
            if v:
                return max(1, int(v))
    except Exception:  # noqa: BLE001
        pass
    return 1


def _choose_tile_n(N, D, O, x_itemsize, t_itemsize, budget_bytes):
    """Largest batch tile (multiple of 8, <=8192) whose double-buffered
    x + targets tiles plus resident W fit the VMEM budget.  Lane padding of
    sub-128 last dims is accounted for (a (tile_n, 16) f32 tile really
    occupies tile_n*128*4 bytes of VMEM)."""
    d_cols = _round_up(max(D, 1), 128)
    o_cols = _round_up(max(O, 1), 128)
    # Resident / fixed footprint: W (2 buffers), b, output block (2 buffers).
    fixed = 2 * _round_up(D, 8) * o_cols * x_itemsize        # W
    fixed += 2 * 8 * o_cols * 4                               # b (padded)
    fixed += 2 * 8 * o_cols * 4                               # out blocks
    per_row = 2 * (d_cols * x_itemsize + o_cols * t_itemsize)  # dbl-buffered
    avail = max(budget_bytes - fixed, 8 * per_row)
    cap = max((avail // per_row) // 8 * 8, 8)
    return max(8, min(cap, 8192, _round_up(N, 8)))


def _sse_kernel(x_ref, w_ref, b_ref, t_ref, out_ref, *,
                n_valid, tile_n, tiles_per_chunk, needs_mask, dot_dtype):
    """One (chunk, tile) step: preds = x @ W + b; accumulate sum over 8-row
    sublane groups of (t-p)^2 directly into the resident (8, O) out block."""
    c = pl.program_id(0)
    t = pl.program_id(1)

    @pl.when(t == 0)
    def _():
        out_ref[...] = jnp.zeros_like(out_ref)

    x = x_ref[...]
    w = w_ref[...]
    if dot_dtype is not None:
        # In-kernel cast only (no extra HBM pass); f32 accumulation on MXU.
        x = x.astype(dot_dtype)
        w = w.astype(dot_dtype)
    preds = jnp.dot(x, w, preferred_element_type=jnp.float32)
    preds = preds + b_ref[...].astype(jnp.float32)
    diff = t_ref[...].astype(jnp.float32) - preds
    dsq = diff * diff                                   # (tile_n, O) f32

    if needs_mask:
        # Zero out rows past the true batch size (ragged last tile and any
        # fully-out-of-range tiles of the last chunk).
        row_start = (c * tiles_per_chunk + t) * tile_n
        row_ids = jax.lax.broadcasted_iota(jnp.int32, dsq.shape, 0)
        dsq = jnp.where(row_ids < (n_valid - row_start), dsq, 0.0)

    rows = dsq.shape[0]
    # Reduce only along the batch axis in sublane groups of 8:
    # layout-preserving reshape + vreg adds (VALU), no cross-lane XLU work.
    partial = dsq.reshape(rows // 8, 8, dsq.shape[1]).sum(axis=0)   # (8, O)
    out_ref[...] += partial


def gaussian_sse(x, w, b, targets, *, tile_n=None, dot_dtype=None):
    """Pallas-computed sum((targets - (x @ w + b))^2), returned as f32 scalar."""
    N, D = x.shape
    O = w.shape[1]
    b = jnp.reshape(b, (1, O))

    vmem_cap = _vmem_capacity_bytes()
    budget = vmem_cap // 2                       # tile budget (headroom)
    vmem_limit = vmem_cap * 3 // 4

    if tile_n is None:
        tile_n = _choose_tile_n(N, D, O,
                                jnp.dtype(x.dtype).itemsize,
                                jnp.dtype(targets.dtype).itemsize,
                                budget)
    tile_n = max(8, _round_up(int(tile_n), 8))

    n_tiles = pl.cdiv(N, tile_n)
    num_cores = _num_tensorcores()               # 1 on v5e/v6e, 2 on v7x
    num_chunks = max(1, min(num_cores, n_tiles))
    tiles_per_chunk = pl.cdiv(n_tiles, num_chunks)
    needs_mask = num_chunks * tiles_per_chunk * tile_n > N

    def _row_block(c, t):
        # Clamp so grid points past the last real tile re-read a valid block;
        # their contribution is zeroed by the in-kernel row mask.
        return (jnp.minimum(c * tiles_per_chunk + t, n_tiles - 1), 0)

    kernel = functools.partial(
        _sse_kernel, n_valid=N, tile_n=tile_n,
        tiles_per_chunk=tiles_per_chunk, needs_mask=needs_mask,
        dot_dtype=dot_dtype)

    partials = pl.pallas_call(
        kernel,
        out_shape=jax.ShapeDtypeStruct((num_chunks * 8, O), jnp.float32),
        grid_spec=pltpu.PrefetchScalarGridSpec(
            num_scalar_prefetch=0,
            grid=(num_chunks, tiles_per_chunk),
            in_specs=[
                pl.BlockSpec((tile_n, D), _row_block),                # x
                pl.BlockSpec((D, O), lambda c, t: (0, 0)),            # W
                pl.BlockSpec((1, O), lambda c, t: (0, 0)),            # b
                pl.BlockSpec((tile_n, O), _row_block),                # targets
            ],
            out_specs=pl.BlockSpec((8, O), lambda c, t: (c, 0)),
        ),
        compiler_params=pltpu.CompilerParams(
            dimension_semantics=("parallel", "arbitrary"),
            vmem_limit_bytes=int(vmem_limit)),
    )(x, w, b, targets)

    # Tiny final reduction (per-chunk (8, O) partials -> scalar) in XLA.
    return jnp.sum(partials)


def loss_gaussian(inputs, targets, w, b, sigma, *,
                  use_pallas=None, tile_n=None, dot_dtype=None):
    """Matches Loss_Gaussian.forward with model(x) = x @ W + b."""
    n = inputs.shape[0]

    if use_pallas is None:
        streamed_bytes = (inputs.size * inputs.dtype.itemsize
                          + targets.size * targets.dtype.itemsize)
        use_pallas = streamed_bytes >= 256 * 1024   # small-problem fast path

    if use_pallas:
        sse = gaussian_sse(inputs, w, b, targets,
                           tile_n=tile_n, dot_dtype=dot_dtype)
    else:
        preds = (inputs.astype(jnp.float32) @ w.astype(jnp.float32)
                 + jnp.reshape(b, (1, -1)).astype(jnp.float32))
        sse = jnp.sum((targets.astype(jnp.float32) - preds) ** 2)

    sigma = jnp.float32(sigma)
    part1 = 0.5 * sse / (sigma ** 2)
    part2 = (n / 2.0) * jnp.log(2.0 * jnp.float32(jnp.pi)) + n * jnp.log(sigma)
    return part1 + part2


def _reference(inputs, targets, w, b, sigma):
    preds = (inputs.astype(jnp.float32) @ w.astype(jnp.float32)
             + jnp.reshape(b, (1, -1)).astype(jnp.float32))
    n = inputs.shape[0]
    part1 = 0.5 * jnp.sum((targets.astype(jnp.float32) - preds) ** 2) / (sigma ** 2)
    part2 = (n / 2.0) * jnp.log(2.0 * jnp.float32(jnp.pi)) + n * jnp.log(sigma)
    return part1 + part2


if __name__ == "__main__":
    key = jax.random.PRNGKey(0)
    sigma = 0.1

    # (N, D, O, forced tile_n) — exercises single-tile, multi-tile, and the
    # ragged / in-kernel-masked (N not a multiple of tile_n) paths.
    cases = [
        (8, 32, 16, None),
        (1024, 128, 64, 128),
        (100, 32, 16, 32),
    ]

    for idx, (N, D, O, tn) in enumerate(cases):
        k_x, k_t, k_w, k_b, key = jax.random.split(key, 5)
        x = jax.random.normal(k_x, (N, D), dtype=jnp.float32)
        t = jax.random.normal(k_t, (N, O), dtype=jnp.float32)
        w = jax.random.normal(k_w, (D, O), dtype=jnp.float32) * 0.1
        b = jax.random.normal(k_b, (1, O), dtype=jnp.float32) * 0.1

        loss = jax.block_until_ready(
            loss_gaussian(x, t, w, b, sigma, use_pallas=True, tile_n=tn))
        ref = jax.block_until_ready(_reference(x, t, w, b, jnp.float32(sigma)))
        assert jnp.allclose(loss, ref, rtol=1e-4, atol=1e-3), (idx, loss, ref)

    # In-kernel bf16 MXU dot path (numerics change -> loose tolerance).
    k_x, k_t, k_w, k_b, key = jax.random.split(key, 5)
    x = jax.random.normal(k_x, (256, 128), dtype=jnp.float32)
    t = jax.random.normal(k_t, (256, 64), dtype=jnp.float32)
    w = jax.random.normal(k_w, (128, 64), dtype=jnp.float32) * 0.1
    b = jax.random.normal(k_b, (1, 64), dtype=jnp.float32) * 0.1
    loss = jax.block_until_ready(
        loss_gaussian(x, t, w, b, sigma, use_pallas=True, tile_n=128,
                      dot_dtype=jnp.bfloat16))
    ref = jax.block_until_ready(_reference(x, t, w, b, jnp.float32(sigma)))
    assert jnp.allclose(loss, ref, rtol=2e-2, atol=2e-1), (loss, ref)

    # Small-problem fast path (auto dispatch to plain XLA) sanity check.
    k_x, k_t, k_w, k_b, key = jax.random.split(key, 5)
    x = jax.random.normal(k_x, (8, 32), dtype=jnp.float32)
    t = jax.random.normal(k_t, (8, 16), dtype=jnp.float32)
    w = jax.random.normal(k_w, (32, 16), dtype=jnp.float32) * 0.1
    b = jax.random.normal(k_b, (1, 16), dtype=jnp.float32) * 0.1
    loss = jax.block_until_ready(loss_gaussian(x, t, w, b, sigma))
    ref = jax.block_until_ready(_reference(x, t, w, b, jnp.float32(sigma)))
    assert jnp.allclose(loss, ref, rtol=1e-5, atol=1e-5), (loss, ref)

    print("KERNEL_OK")
</pallas_src>

<mosaic_0001>
module attributes {stable_mosaic.version = 11 : i64} {
  func.func @_sse_kernel(%arg0: i32, %arg1: i32, %arg2: memref<8x32xf32, #tpu.memory_space<vmem>>, %arg3: memref<32x16xf32, #tpu.memory_space<vmem>>, %arg4: memref<1x16xf32, #tpu.memory_space<vmem>>, %arg5: memref<8x16xf32, #tpu.memory_space<vmem>>, %arg6: memref<8x16xf32, #tpu.memory_space<vmem>>) attributes {dimension_semantics = [#tpu.dimension_semantics<parallel>, #tpu.dimension_semantics<arbitrary>], iteration_bounds = array<i64: 1, 1>, scalar_prefetch = 0 : i64, scratch_operands = 0 : i64, tpu.core_type = #tpu.core_type<tc>, window_params = [{transform_indices = @transform_0, window_bounds = array<i64: 8, 32>}, {pipeline_mode = #tpu.pipeline_mode<synchronous>, transform_indices = @transform_1, window_bounds = array<i64: 32, 16>}, {pipeline_mode = #tpu.pipeline_mode<synchronous>, transform_indices = @transform_2, window_bounds = array<i64: 1, 16>}, {transform_indices = @transform_3, window_bounds = array<i64: 8, 16>}, {transform_indices = @transform_4, window_bounds = array<i64: 8, 16>}]} {
    %c0_i32 = arith.constant 0 : i32
    %0 = arith.cmpi eq, %arg1, %c0_i32 : i32
    %1 = arith.extui %0 : i1 to i32
    %c0_i32_0 = arith.constant 0 : i32
    %2 = arith.cmpi ne, %1, %c0_i32_0 : i32
    scf.if %2 {
      %cst_13 = arith.constant 0.000000e+00 : f32
      %17 = vector.broadcast %cst_13 : f32 to vector<8x16xf32>
      %c0_14 = arith.constant 0 : index
      %c0_15 = arith.constant 0 : index
      %18 = vector.load %arg6[%c0_14, %c0_15] : memref<8x16xf32, #tpu.memory_space<vmem>>, vector<8x16xf32>
      tpu.vector_store %arg6[%c0_14, %c0_15], %17 {strides = array<i32>} : memref<8x16xf32, #tpu.memory_space<vmem>>, vector<8x16xf32>,
    } else {
    }
    %c0 = arith.constant 0 : index
    %c0_1 = arith.constant 0 : index
    %3 = vector.load %arg2[%c0, %c0_1] : memref<8x32xf32, #tpu.memory_space<vmem>>, vector<8x32xf32>
    %c0_2 = arith.constant 0 : index
    %c0_3 = arith.constant 0 : index
    %4 = vector.load %arg3[%c0_2, %c0_3] : memref<32x16xf32, #tpu.memory_space<vmem>>, vector<32x16xf32>
    %cst = arith.constant dense<0.000000e+00> : vector<8x16xf32>
    %5 = tpu.matmul %3, %4, %cst {dimension_numbers = #tpu.dot_dimension_numbers<[1], [0], [0], [1], [0, 0, 1, 1], [], []>} : vector<8x32xf32>, vector<32x16xf32>, vector<8x16xf32> -> vector<8x16xf32>
    %c0_4 = arith.constant 0 : index
    %c0_5 = arith.constant 0 : index
    %6 = vector.load %arg4[%c0_4, %c0_5] : memref<1x16xf32, #tpu.memory_space<vmem>>, vector<1x16xf32>
    %7 = vector.broadcast %6 : vector<1x16xf32> to vector<8x16xf32>
    %8 = arith.addf %5, %7 : vector<8x16xf32>
    %c0_6 = arith.constant 0 : index
    %c0_7 = arith.constant 0 : index
    %9 = vector.load %arg5[%c0_6, %c0_7] : memref<8x16xf32, #tpu.memory_space<vmem>>, vector<8x16xf32>
    %10 = arith.subf %9, %8 : vector<8x16xf32>
    %11 = arith.mulf %10, %10 : vector<8x16xf32>
    %12 = vector.shape_cast %11 : vector<8x16xf32> to vector<1x8x16xf32>
    %cst_8 = arith.constant dense<0.000000e+00> : vector<8x16xf32>
    %13 = vector.multi_reduction <add>, %12, %cst_8 [0] : vector<1x8x16xf32> to vector<8x16xf32>
    %c0_9 = arith.constant 0 : index
    %c0_10 = arith.constant 0 : index
    %14 = vector.load %arg6[%c0_9, %c0_10] : memref<8x16xf32, #tpu.memory_space<vmem>>, vector<8x16xf32>
    %15 = arith.addf %14, %13 : vector<8x16xf32>
    %c0_11 = arith.constant 0 : index
    %c0_12 = arith.constant 0 : index
    %16 = vector.load %arg6[%c0_11, %c0_12] : memref<8x16xf32, #tpu.memory_space<vmem>>, vector<8x16xf32>
    tpu.vector_store %arg6[%c0_11, %c0_12], %15 {strides = array<i32>} : memref<8x16xf32, #tpu.memory_space<vmem>>, vector<8x16xf32>,
    return
  }
  func.func @transform_0(%arg0: i32, %arg1: i32) -> (i32, i32) {
    %c1_i32 = arith.constant 1 : i32
    %0 = arith.muli %arg0, %c1_i32 : i32
    %1 = arith.addi %0, %arg1 : i32
    %c0_i32 = arith.constant 0 : i32
    %2 = arith.minsi %1, %c0_i32 : i32
    %c0_i32_0 = arith.constant 0 : i32
    %c0_i32_1 = arith.constant 0 : i32
    return %2, %c0_i32_0 : i32, i32
  }
  func.func @transform_1(%arg0: i32, %arg1: i32) -> (i32, i32) {
    %c0_i32 = arith.constant 0 : i32
    %c0_i32_0 = arith.constant 0 : i32
    %c0_i32_1 = arith.constant 0 : i32
    return %c0_i32, %c0_i32_0 : i32, i32
  }
  func.func @transform_2(%arg0: i32, %arg1: i32) -> (i32, i32) {
    %c0_i32 = arith.constant 0 : i32
    %c0_i32_0 = arith.constant 0 : i32
    %c0_i32_1 = arith.constant 0 : i32
    return %c0_i32, %c0_i32_0 : i32, i32
  }
  func.func @transform_3(%arg0: i32, %arg1: i32) -> (i32, i32) {
    %c1_i32 = arith.constant 1 : i32
    %0 = arith.muli %arg0, %c1_i32 : i32
    %1 = arith.addi %0, %arg1 : i32
    %c0_i32 = arith.constant 0 : i32
    %2 = arith.minsi %1, %c0_i32 : i32
    %c0_i32_0 = arith.constant 0 : i32
    %c0_i32_1 = arith.constant 0 : i32
    return %2, %c0_i32_0 : i32, i32
  }
  func.func @transform_4(%arg0: i32, %arg1: i32) -> (i32, i32) {
    %c0_i32 = arith.constant 0 : i32
    %c0_i32_0 = arith.constant 0 : i32
    return %arg0, %c0_i32 : i32, i32
  }
}

</mosaic_0001>

<bundles_post_ra>
// kernel: tpu_custom_call.1
= control target key start
LH: loop header
LB: loop body
LE: loop exit
PB: predicated region body
PF: predicated region fallthrough
CT: control target
= control target key end

     0   :  { %vm76_vm0 = vcmask 130048   ;;  %v177_v2 = vmov 0.0   ;;  %s230_s0 = inlined_call_operand.vmem [shape: f32[8,32], index: 0, kind: input, shape index: {}]   ;;  %s231_s1 = inlined_call_operand.vmem [shape: f32[32,16], index: 1, kind: input, shape index: {}]   ;;  %s232_s2 = inlined_call_operand.vmem [shape: f32[1,16], index: 2, kind: input, shape index: {}]   ;;  %s233_s3 = inlined_call_operand.vmem [shape: f32[8,16], index: 3, kind: input, shape index: {}]   ;;  %s234_s4 = inlined_call_operand.hbm [shape: f32[8,16], index: 4, kind: output, shape index: {}]  }
   0x1   :  { %v82_v0 = vld [vmem:[%s231_s1 + $0x18] sm:$0xff]  ;;  %v81_v1 = vld [vmem:[%s231_s1 + $0x10] sm:$0xff]  ;;  %77 = vst.msk [vmem:[#allocation2] sm:$0xff] %vm76_vm0, %v177_v2  ;;  %v80_v3 = vld [vmem:[%s231_s1 + $0x8] sm:$0xff] }
   0x2   :  { %103 = vmatpush.msra.mxu0 %v82_v0 }
   0x3   :  { %9 = vsyncpa [#allocation3], 0  ;;  %v79_v4 = vld [vmem:[%s231_s1] sm:$0xff]  ;;  %vm87_vm1 = vcmask 261120   ;;  %s178_s1 = smov [#allocation2]  }
   0x4   :  { %104 = vmatpush.msra.mxu0 %v81_v1  ;;  %v78_v5 = vld [vmem:[%s230_s0] sm:$0xff]  ;;  %s124_s29 = sshll.u32 %s178_s1, 4  ;;  %s126_s0 = sshll.u32 %s234_s4, 4  ;;  %s125_s29 = int_to_ptr.vmem [resolvable:$true] %s124_s29  ;;  %s127_s0 = int_to_ptr.hbm [resolvable:$true] %s126_s0 }
   0x5   :  { %v150_v6 = vld [vmem:[%s232_s2] ss:$0 sm:$0xff] }
   0x6   :  { %105 = vmatpush.msra.mxu0 %v80_v3  ;;  %v111_v8 = vld [vmem:[%s233_s3] sm:$0xff] }
   0x8   :  { %106 = vmatpush.msra.mxu0 %v79_v4  ;;  %v115_v11 = vld [vmem:[#allocation2] sm:$0xff] }
   0x9   :  { %147 = vmatmul.msk.f32.vlgmr.msra.gmra.mxu0 %vm87_vm1, %v78_v5 }
  0x86   :  { %v108_v7 = vpop.f32.mrf.mxu0 }
  0x87   :  { %v109_v9 = vadd.f32 %v150_v6, %v108_v7 }
  0x89   :  { %v112_v10 = vsub.f32 %v111_v8, %v109_v9 }
  0x8b   :  { %v113_v12 = vmul.f32 %v112_v10, %v112_v10 }
  0x8d   :  { %v116_v13 = vadd.f32 %v115_v11, %v113_v12 }
  0x8f   :  { %118 = vst.msk [vmem:[#allocation2] sm:$0xff] %vm76_vm0, %v116_v13 }
  0x90   :  { %129 = dma.vmem_to_hbm [thread:$0]  %s125_s29, 128, %s127_s0, [#allocation3]  }
  0x91   :  { %175 = dma.done.wait [#allocation3], 128  }
  0x92   :  { %176 = vsyncadd [#allocation3], 4294967168 }
  0x93   :  { %134 = vsyncpa [#allocation3], 1 }

</bundles_post_ra>
